<compile_context>
chip_gen: v7x
topology: tpu7x:2x2x1
jax: 0.10.0
libtpu: 0.0.40
codegen_flags: <defaults>
</compile_context>

<pallas_src>
import jax
import jax.numpy as jnp
from jax.experimental import pallas as pl
from jax.experimental.pallas import tpu as pltpu


def _mlp_kernel(x_ref, w1_ref, b1_ref, w2_ref, b2_ref, o_ref):
    # Layer 1: bf16 MXU matmul with f32 accumulation; bias + ReLU in f32.
    h = jnp.dot(x_ref[...], w1_ref[...], preferred_element_type=jnp.float32)
    h = jnp.maximum(h + b1_ref[...], 0.0)            # (tb, hidden) + (1, hidden)
    # Layer 2: cast activations back to the weight dtype (bf16) for the MXU,
    # accumulate in f32, add bias in f32.  Output stays lane-dense (out_dim
    # is the full last dim) so the store epilogue uses unmasked vst.
    y = jnp.dot(h.astype(w2_ref.dtype), w2_ref[...],
                preferred_element_type=jnp.float32)
    o_ref[...] = (y + b2_ref[...]).astype(o_ref.dtype)


def _round_up(x, m):
    return ((x + m - 1) // m) * m


def projection_mlp(x, w1, b1, w2, b2, *, tb=None, compute_dtype=jnp.bfloat16):
    """SimCLR projection head forward.

    x:  (B, in_dim) float32
    w1: (in_dim, hidden)  (pre-transposed vs. PyTorch's (hidden, in_dim))
    b1: (hidden,)
    w2: (hidden, out_dim) (pre-transposed)
    b2: (out_dim,)
    Returns (B, out_dim) float32.
    """
    B, in_dim = x.shape
    hidden = w1.shape[1]
    out_dim = w2.shape[1]

    if tb is None:
        # Fixed batch tile: 128 rows matches the v5e MXU M-dim and divides the
        # 256-wide v6e/v7x MXU cleanly; shrink (multiple of 8) for tiny batches.
        tb = 128 if B >= 128 else _round_up(B, 8)
    tb = max(8, _round_up(int(tb), 8))

    # Ragged batch: pad rows up to a multiple of the tile, slice afterwards.
    Bp = _round_up(B, tb)
    if Bp != B:
        x = jnp.pad(x, ((0, Bp - B), (0, 0)))

    # bf16 matmul inputs (f32 accumulation inside the kernel); biases stay f32
    # and 2-D (1, dim) for TPU lane layout.
    xc = x.astype(compute_dtype)
    w1c = w1.astype(compute_dtype)
    w2c = w2.astype(compute_dtype)
    b1_2d = b1.reshape(1, hidden).astype(jnp.float32)
    b2_2d = b2.reshape(1, out_dim).astype(jnp.float32)

    grid = (Bp // tb,)

    # Explicit VMEM budget: single-buffered resident weights + biases,
    # double-buffered x / out tiles, f32 intermediate h, plus slack.
    wsz = jnp.dtype(compute_dtype).itemsize
    vmem_bytes = (
        (in_dim * hidden + hidden * out_dim) * wsz      # W1, W2 (1 buffer each)
        + (hidden + out_dim) * 4                        # biases
        + 2 * tb * in_dim * wsz                         # x tile, double-buffered
        + 2 * tb * out_dim * 4                          # out tile, double-buffered
        + tb * hidden * 4                               # h intermediate (f32)
    )
    # Floor at the 32 MiB default, cap at 64 MiB so it is legal on v7x too.
    vmem_limit = int(min(max(2 * vmem_bytes + (2 << 20), 32 << 20), 64 << 20))

    # Weights/biases never change across grid steps -> single buffer is enough.
    const_mode = pl.Buffered(1)

    out = pl.pallas_call(
        _mlp_kernel,
        out_shape=jax.ShapeDtypeStruct((Bp, out_dim), jnp.float32),
        grid_spec=pl.GridSpec(
            grid=grid,
            in_specs=[
                pl.BlockSpec((tb, in_dim), lambda i: (i, 0)),          # x tile
                pl.BlockSpec((in_dim, hidden), lambda i: (0, 0),       # W1 (resident)
                             pipeline_mode=const_mode),
                pl.BlockSpec((1, hidden), lambda i: (0, 0),            # b1
                             pipeline_mode=const_mode),
                pl.BlockSpec((hidden, out_dim), lambda i: (0, 0),      # W2 (resident)
                             pipeline_mode=const_mode),
                pl.BlockSpec((1, out_dim), lambda i: (0, 0),           # b2
                             pipeline_mode=const_mode),
            ],
            out_specs=pl.BlockSpec((tb, out_dim), lambda i: (i, 0)),
        ),
        compiler_params=pltpu.CompilerParams(
            dimension_semantics=("parallel",),      # batch axis: megacore-shardable
            vmem_limit_bytes=vmem_limit,
        ),
    )(xc, w1c, b1_2d, w2c, b2_2d)

    return out[:B] if Bp != B else out


def _init_linear(key, fan_in, fan_out, dtype=jnp.float32):
    """Deterministic init matching nn.Linear's uniform(-1/sqrt(fan_in), ...).
    Returns W in (fan_in, fan_out) layout (already transposed) and bias."""
    kw, kb = jax.random.split(key)
    bound = 1.0 / jnp.sqrt(fan_in)
    w = jax.random.uniform(kw, (fan_in, fan_out), dtype, -bound, bound)
    b = jax.random.uniform(kb, (fan_out,), dtype, -bound, bound)
    return w, b


if __name__ == "__main__":
    # Small shapes consistent with the module: projection head on flat features.
    # B=36 is intentionally NOT a multiple of the tile to exercise the padding
    # path; tb=8 gives a 5-step grid so the pipelined path is exercised too.
    B, in_dim, out_dim = 36, 128, 256
    hidden_dim = in_dim  # per module __init__

    key = jax.random.PRNGKey(0)
    kx, k1, k2 = jax.random.split(key, 3)

    x = jax.random.normal(kx, (B, in_dim), jnp.float32)
    w1, b1 = _init_linear(k1, in_dim, hidden_dim)
    w2, b2 = _init_linear(k2, hidden_dim, out_dim)

    y = projection_mlp(x, w1, b1, w2, b2, tb=8)
    y = jax.block_until_ready(y)

    # Reference check in plain f32 JAX (same math as the PyTorch forward).
    h_ref = jnp.maximum(x @ w1 + b1, 0.0)
    y_ref = h_ref @ w2 + b2
    assert y.shape == (B, out_dim)
    # Tolerance loosened for bf16 matmul inputs (f32 accumulation).
    max_err = float(jnp.max(jnp.abs(y - y_ref)))
    assert jnp.allclose(y, y_ref, atol=8e-2, rtol=5e-2), max_err

    print("KERNEL_OK")
</pallas_src>

<mosaic_0001>
module attributes {stable_mosaic.version = 11 : i64} {
  func.func @_mlp_kernel(%arg0: i32, %arg1: memref<8x128xbf16, #tpu.memory_space<vmem>>, %arg2: memref<128x128xbf16, #tpu.memory_space<vmem>>, %arg3: memref<1x128xf32, #tpu.memory_space<vmem>>, %arg4: memref<128x256xbf16, #tpu.memory_space<vmem>>, %arg5: memref<1x256xf32, #tpu.memory_space<vmem>>, %arg6: memref<8x256xf32, #tpu.memory_space<vmem>>) attributes {dimension_semantics = [#tpu.dimension_semantics<parallel>], iteration_bounds = array<i64: 5>, scalar_prefetch = 0 : i64, scratch_operands = 0 : i64, tpu.core_type = #tpu.core_type<tc>, window_params = [{transform_indices = @transform_0, window_bounds = array<i64: 8, 128>}, {pipeline_mode = #tpu.pipeline_mode<synchronous>, transform_indices = @transform_1, window_bounds = array<i64: 128, 128>}, {pipeline_mode = #tpu.pipeline_mode<synchronous>, transform_indices = @transform_2, window_bounds = array<i64: 1, 128>}, {pipeline_mode = #tpu.pipeline_mode<synchronous>, transform_indices = @transform_3, window_bounds = array<i64: 128, 256>}, {pipeline_mode = #tpu.pipeline_mode<synchronous>, transform_indices = @transform_4, window_bounds = array<i64: 1, 256>}, {transform_indices = @transform_5, window_bounds = array<i64: 8, 256>}]} {
    %c0 = arith.constant 0 : index
    %c0_0 = arith.constant 0 : index
    %0 = vector.load %arg1[%c0, %c0_0] : memref<8x128xbf16, #tpu.memory_space<vmem>>, vector<8x128xbf16>
    %c0_1 = arith.constant 0 : index
    %c0_2 = arith.constant 0 : index
    %1 = vector.load %arg2[%c0_1, %c0_2] : memref<128x128xbf16, #tpu.memory_space<vmem>>, vector<128x128xbf16>
    %cst = arith.constant dense<0.000000e+00> : vector<8x128xf32>
    %2 = tpu.matmul %0, %1, %cst {dimension_numbers = #tpu.dot_dimension_numbers<[1], [0], [0], [1], [0, 0, 1, 1], [], []>} : vector<8x128xbf16>, vector<128x128xbf16>, vector<8x128xf32> -> vector<8x128xf32>
    %c0_3 = arith.constant 0 : index
    %c0_4 = arith.constant 0 : index
    %3 = vector.load %arg3[%c0_3, %c0_4] : memref<1x128xf32, #tpu.memory_space<vmem>>, vector<1x128xf32>
    %4 = vector.broadcast %3 : vector<1x128xf32> to vector<8x128xf32>
    %5 = arith.addf %2, %4 : vector<8x128xf32>
    %cst_5 = arith.constant 0.000000e+00 : f32
    %6 = vector.broadcast %cst_5 : f32 to vector<8x128xf32>
    %7 = arith.maximumf %5, %6 : vector<8x128xf32>
    %8 = arith.truncf %7 : vector<8x128xf32> to vector<8x128xbf16>
    %c0_6 = arith.constant 0 : index
    %c0_7 = arith.constant 0 : index
    %9 = vector.load %arg4[%c0_6, %c0_7] : memref<128x256xbf16, #tpu.memory_space<vmem>>, vector<128x256xbf16>
    %cst_8 = arith.constant dense<0.000000e+00> : vector<8x256xf32>
    %10 = tpu.matmul %8, %9, %cst_8 {dimension_numbers = #tpu.dot_dimension_numbers<[1], [0], [0], [1], [0, 0, 1, 1], [], []>} : vector<8x128xbf16>, vector<128x256xbf16>, vector<8x256xf32> -> vector<8x256xf32>
    %c0_9 = arith.constant 0 : index
    %c0_10 = arith.constant 0 : index
    %11 = vector.load %arg5[%c0_9, %c0_10] : memref<1x256xf32, #tpu.memory_space<vmem>>, vector<1x256xf32>
    %12 = vector.broadcast %11 : vector<1x256xf32> to vector<8x256xf32>
    %13 = arith.addf %10, %12 : vector<8x256xf32>
    %c0_11 = arith.constant 0 : index
    %c0_12 = arith.constant 0 : index
    %14 = vector.load %arg6[%c0_11, %c0_12] : memref<8x256xf32, #tpu.memory_space<vmem>>, vector<8x256xf32>
    tpu.vector_store %arg6[%c0_11, %c0_12], %13 {strides = array<i32>} : memref<8x256xf32, #tpu.memory_space<vmem>>, vector<8x256xf32>,
    return
  }
  func.func @transform_0(%arg0: i32) -> (i32, i32) {
    %c0_i32 = arith.constant 0 : i32
    %c0_i32_0 = arith.constant 0 : i32
    return %arg0, %c0_i32 : i32, i32
  }
  func.func @transform_1(%arg0: i32) -> (i32, i32) {
    %c0_i32 = arith.constant 0 : i32
    %c0_i32_0 = arith.constant 0 : i32
    %c0_i32_1 = arith.constant 0 : i32
    return %c0_i32, %c0_i32_0 : i32, i32
  }
  func.func @transform_2(%arg0: i32) -> (i32, i32) {
    %c0_i32 = arith.constant 0 : i32
    %c0_i32_0 = arith.constant 0 : i32
    %c0_i32_1 = arith.constant 0 : i32
    return %c0_i32, %c0_i32_0 : i32, i32
  }
  func.func @transform_3(%arg0: i32) -> (i32, i32) {
    %c0_i32 = arith.constant 0 : i32
    %c0_i32_0 = arith.constant 0 : i32
    %c0_i32_1 = arith.constant 0 : i32
    return %c0_i32, %c0_i32_0 : i32, i32
  }
  func.func @transform_4(%arg0: i32) -> (i32, i32) {
    %c0_i32 = arith.constant 0 : i32
    %c0_i32_0 = arith.constant 0 : i32
    %c0_i32_1 = arith.constant 0 : i32
    return %c0_i32, %c0_i32_0 : i32, i32
  }
  func.func @transform_5(%arg0: i32) -> (i32, i32) {
    %c0_i32 = arith.constant 0 : i32
    %c0_i32_0 = arith.constant 0 : i32
    return %arg0, %c0_i32 : i32, i32
  }
}

</mosaic_0001>

<bundles_post_ra>
// kernel: tpu_custom_call.1
= control target key start
LH: loop header
LB: loop body
LE: loop exit
PB: predicated region body
PF: predicated region fallthrough
CT: control target
= control target key end

     0   :  { %10 = vsyncpa [#allocation3], 0  ;;  %s1246_s0 = inlined_call_operand.hbm [shape: bf16[40,128], index: 0, kind: input, shape index: {}]   ;;  %s1247_s1 = inlined_call_operand.hbm [shape: bf16[128,128], index: 1, kind: input, shape index: {}]   ;;  %s1248_s2 = inlined_call_operand.vmem [shape: f32[1,128], index: 2, kind: input, shape index: {}]   ;;  %s1249_s3 = inlined_call_operand.hbm [shape: bf16[128,256], index: 3, kind: input, shape index: {}]   ;;  %s1250_s4 = inlined_call_operand.vmem [shape: f32[1,256], index: 4, kind: input, shape index: {}]   ;;  %s1251_s5 = inlined_call_operand.hbm [shape: f32[40,256], index: 5, kind: output, shape index: {}]  }
   0x1   :  { %12 = vsyncpa [#allocation3 + $0x1], 0 }
   0x2   :  { %13 = vsyncpa [#allocation6], 0 }
   0x3   :  { %14 = vsyncpa [#allocation4], 0 }
   0x4   :  { %16 = vsyncpa [#allocation4 + $0x1], 0  ;;  %s1016_s18 = smov 0   ;;  %s1018_s19 = smov 0  }
   0x5   :  { %s1020_s20 = smov 0   ;;  %s1022_s21 = smov 0  }
   0x6 LB: > { %s1037_s22 = sadd.s32 4294967295, %s973_s21   ;;  %s639_s23 = sadd.s32 4294967294, %s973_s21   ;;  %s973_s21 = sphi %s1022_s21, %s1270_s21   ;;  %s969_s20 = sphi %s1020_s20, %s1269_s20   ;;  %s965_s19 = sphi %s1018_s19, %s1268_s19   ;;  %s961_s18 = sphi %s1016_s18, %s1267_s18  }
   0x7   : > { %p42_p0 = scmp.ne.s32.totalorder %s965_s19, %s961_s18  ;;  %p1252_p1 = scmp.eq.s32.totalorder %s1037_s22, 0 }
   0x8   : > { %p156_p3 = scmp.eq.s32.totalorder %s639_s23, 4  ;;  %p640_p5 = scmp.ge.s32.totalorder %s973_s21, 1 }
   0x9   : > { %p1046_p4 = por %p1252_p1, %p42_p0  ;;  %p163_p7 = scmp.lt.s32.totalorder %s973_s21, 6 }
   0xa   : > { %p1051_p6 = por %p156_p3, %p42_p0  ;;  %s975_s27 = smov [#allocation5]  }
   0xb   : > { %s1255_s24 = scalar_select %p1046_p4, 1, 0 }
   0xc   : > { %s1256_s25 = scalar_select %p1051_p6, 1, 0 }
   0xd   : > { %p1056_p8 = pnand %p640_p5, %p163_p7  ;;  %s175_s28 = sshll.u32 %s975_s27, 4  ;;  %s176_s28 = int_to_ptr.vmem [resolvable:$true] %s175_s28 }
   0xe   : > { %s976_s30 = smov [#allocation7]   ;;  %s817_s9 = scalar_lea.hbm %s1247_s1, 1024 }
   0xf   : > { %s1257_s26 = scalar_select %p1056_p8, 1, 0 }
  0x10   : > { %p723_p9 = pneg %p1056_p8  ;;  %s191_s6 = sshll.u32 %s976_s30, 4  ;;  %s1068_s6 = int_to_ptr.vmem [resolvable:$true] %s191_s6 }
  0x11   : > { %p818_p11 = scmp.ne.s32.totalorder %s1247_s1, %s817_s9  ;;  %p824_p3 = scmp.lt.u32.totalorder %s817_s9, %s1247_s1 }
  0x12   : > { %p1064_p10 = pnand %p723_p9, %p1252_p1 }
  0x14   : > { %p819_p12 = pneg %p1064_p10 }
  0x16   : > { %p820_p13 = pnand %p819_p12, %p818_p11 }
  0x18   : > { %p821_p0 = pneg %p820_p13 }
  0x1a   : > { %p826_p5 = pnand %p824_p3, %p821_p0 }
  0x1c   : > { %829 = shalt.err (!%p826_p5)
}
  0x1d   : > { %s830_s14 = scalar_lea.vmem %s176_s28, 1024  ;;  %p838_p2 = scmp.lt.s32.totalorder %s176_s28, %s176_s28 }
  0x1e   : > { %p831_p7 = scmp.ne.s32.totalorder %s176_s28, %s830_s14  ;;  %p839_p6 = scmp.lt.s32.totalorder %s830_s14, %s830_s14 }
  0x20   : > { %p833_p9 = pnand %p831_p7, %p819_p12  ;;  %p840_p4 = por %p839_p6, %p838_p2 }
  0x22   : > { %p834_p1 = pneg %p833_p9 }
  0x24   : > { %p841_p8 = pnand %p840_p4, %p834_p1 }
  0x26   : > { %844 = shalt.err (!%p841_p8)
}
  0x27   : > { %s977_s15 = smov 64   ;;  %s978_s16 = smov 4  }
  0x28   : > { %726 = dma.hbm_to_vmem [thread:$0]  (!%p1064_p10), %s1247_s1, 1024, %s176_s28, [#allocation6], %s977_s15, %s977_s15, %s978_s16  }
  0x29   : > { %s845_s7 = scalar_lea.hbm %s1249_s3, 2048 }
  0x2a   : > { %p846_p11 = scmp.ne.s32.totalorder %s1249_s3, %s845_s7  ;;  %p852_p4 = scmp.lt.u32.totalorder %s845_s7, %s1249_s3 }
  0x2c   : > { %p848_p1 = pnand %p846_p11, %p819_p12 }
  0x2e   : > { %p849_p2 = pneg %p848_p1 }
  0x30   : > { %p854_p6 = pnand %p852_p4, %p849_p2 }
  0x32   : > { %857 = shalt.err (!%p854_p6)
}
  0x33   : > { %s858_s28 = scalar_lea.vmem %s1068_s6, 2048  ;;  %p866_p3 = scmp.lt.s32.totalorder %s1068_s6, %s1068_s6 }
  0x34   : > { %p859_p8 = scmp.ne.s32.totalorder %s1068_s6, %s858_s28  ;;  %p867_p5 = scmp.lt.s32.totalorder %s858_s28, %s858_s28 }
  0x36   : > { %p861_p13 = pnand %p859_p8, %p819_p12  ;;  %p868_p7 = por %p867_p5, %p866_p3 }
  0x38   : > { %p862_p0 = pneg %p861_p13 }
  0x3a   : > { %p869_p9 = pnand %p868_p7, %p862_p0 }
  0x3c   : > { %872 = shalt.err (!%p869_p9)
}
  0x3d   : > { %s979_s12 = smov 128   ;;  %s980_s13 = smov 8  }
  0x3e   : > { %729 = dma.hbm_to_vmem [thread:$0]  (!%p1064_p10), %s1249_s3, 2048, %s1068_s6, [#allocation6], %s979_s12, %s979_s12, %s980_s13  }
  0x3f   : > { %s1118_s16 = sadd.s32 1, %s973_s21   ;;  %s29_s23 = sadd.s32 1, %s969_s20 }
  0x40   : > { %s26_s17 = ssub.s32 %s973_s21, %s1118_s16  ;;  %p36_p11 = scmp.ne.s32.totalorder %s969_s20, %s965_s19 }
  0x41   : > { %p27_p12 = scmp.eq.s32.totalorder %s26_s17, 0  ;;  %p37_p1 = scmp.eq.s32.totalorder %s973_s21, 0 }
  0x42   : > { %p1259_p4 = scmp.eq.s32.totalorder %s1037_s22, 4  ;;  %p740_p8 = scmp.lt.s32.totalorder %s973_s21, 5 }
  0x43   : > { %s1127_s27 = scalar_select %p27_p12, %s969_s20, %s29_s23  }
  0x44   : > { %p38_p2 = por %p37_p1, %p36_p11  ;;  %p1131_p6 = por %p1259_p4, %p36_p11 }
  0x45   : > { %s208_s29 = sand.u32 1, %s969_s20   ;;  %s645_s6 = sshll.u32 %s973_s21, 6 }
  0x46   : > { %s644_s7 = sshll.u32 %s208_s29, 2  ;;  %s1141_s10 = scalar_lea.hbm %s1246_s0, %s645_s6 }
  0x47   : > { %s212_s11 = scalar_lea.vmem [#allocation2], %s644_s7  ;;  %p1145_p10 = pnand %p740_p8, %p38_p2 }
  0x48   : > { %s219_s28 = sshll.u32 %s212_s11, 4  ;;  %s209_s13 = scalar_lea.sflag [#allocation3], %s208_s29  ;;  %s1143_s28 = int_to_ptr.vmem [resolvable:$true] %s219_s28 }
  0x49   : > { %s873_s14 = scalar_lea.hbm %s1141_s10, 64  ;;  %p875_p0 = pneg %p1145_p10 }
  0x4a   : > { %p874_p13 = scmp.ne.s32.totalorder %s1141_s10, %s873_s14  ;;  %s878_s23 = scalar_lea.hbm %s1246_s0, 320 }
  0x4b   : > { %p879_p7 = scmp.lt.u32.totalorder %s1141_s10, %s1246_s0  ;;  %p880_p9 = scmp.lt.u32.totalorder %s878_s23, %s873_s14 }
  0x4c   : > { %p876_p3 = pnand %p875_p0, %p874_p13  ;;  %p882_p11 = scmp.lt.u32.totalorder %s873_s14, %s1141_s10 }
  0x4d   : > { %p881_p12 = por %p880_p9, %p879_p7 }
  0x4e   : > { %p877_p5 = pneg %p876_p3 }
  0x4f   : > { %p883_p1 = por %p882_p11, %p881_p12 }
  0x51   : > { %p884_p2 = pnand %p883_p1, %p877_p5 }
  0x53   : > { %887 = shalt.err (!%p884_p2)
}
  0x54   : > { %s888_s29 = scalar_lea.vmem %s1143_s28, 64  ;;  %s981_s8 = smov [#allocation2]  }
  0x55   : > { %p889_p4 = scmp.ne.s32.totalorder %s1143_s28, %s888_s29  ;;  %s893_s9 = sshll.u32 %s981_s8, 4  ;;  %s894_s9 = int_to_ptr.vmem [resolvable:$false] %s893_s9 }
  0x56   : > { %s895_s11 = scalar_lea.vmem %s894_s9, 128  ;;  %p896_p3 = scmp.lt.s32.totalorder %s1143_s28, %s894_s9 }
  0x57   : > { %p891_p8 = pnand %p889_p4, %p875_p0  ;;  %p897_p7 = scmp.lt.s32.totalorder %s895_s11, %s888_s29 }
  0x59   : > { %p892_p13 = pneg %p891_p8  ;;  %p898_p9 = por %p897_p7, %p896_p3 }
  0x5b   : > { %p899_p12 = pnand %p898_p9, %p892_p13 }
  0x5d   : > { %902 = shalt.err (!%p899_p12)
}
  0x5e   : > { %733 = dma.hbm_to_vmem [thread:$0]  (!%p1145_p10), %s1141_s10, 64, %s1143_s28, %s209_s13  }
  0x5f   : > { %p1262_p5 = scmp.ne.s32.totalorder %s1257_s26, 0 }
  0x60   : > { %s1177_s14 = sand.u32 (!%p1262_p5), 1, %s965_s19   ;;  %p1263_p0 = scmp.ne.s32.totalorder (!%p1262_p5), %s1255_s24, 0 }
  0x61   : > { %228 = sbr.rel (%p1262_p5) target bundleno = 588 (0x24c), region = 40  ;;  %s647_s15 = sshll.u32 (!%p1262_p5), %s1177_s14, 2 }
  0x62   : > { %s231_s17 = scalar_lea.sflag (!%p1262_p5), [#allocation3], %s1177_s14  ;;  %s1181_s23 = scalar_lea.vmem (!%p1262_p5), [#allocation2], %s647_s15 }
  0x68   : > { %948 = dma.done.wait (%p1263_p0), %s231_s17, 64  }
  0x69   : > { %950 = vsyncadd (%p1263_p0), %s231_s17, 4294967232  ;;  %p1264_p10 = scmp.eq.s32.totalorder %s1037_s22, 0 }
  0x6b   : > { %952 = dma.done.wait (%p1264_p10), [#allocation6], 3072   ;;  %p1265_p11 = pmov %p1264_p10 }
  0x6c   : > { %v982_v0 = vmov 0.0   ;;  %vm983_vm0 = vmmov 0   ;;  %v785_v1 = vld [vmem:[#allocation5] sm:$0xff]   ;;  %v786_v2 = vld [vmem:[#allocation5 + $0x8] sm:$0xff]   ;;  %v787_v3 = vld [vmem:[#allocation5 + $0x10] sm:$0xff]   ;;  %v984_v26 = vmov 0   ;;  %v402_v35 = vlaneseq }
  0x6d   : > { %954 = vsyncadd (%p1265_p11), [#allocation6], 4294964224  ;;  %691 = vmatprep.subr.bf16.mxu0 %v982_v0  ;;  %707 = vmatprep.mubr.msk.bf16.mxu0 %vm983_vm0, %v982_v0  ;;  %v793_v4 = vld [vmem:[#allocation7 + $0x4] ss:$8 sps:$4 sm:$0xff]   ;;  %v795_v5 = vld [vmem:[#allocation7] ss:$8 sps:$4 sm:$0xff]  }
  0x6e   : > { %692 = vmatpush3.bf16.msra.mxu0 %v785_v1  ;;  %v788_v6 = vld [vmem:[#allocation5 + $0x18] sm:$0xff]   ;;  %492 = vmatprep.subr.bf16.mxu1 %v793_v4  ;;  %v799_v9 = vld [vmem:[#allocation7 + $0x24] ss:$8 sps:$4 sm:$0xff]   ;;  %v801_v11 = vld [vmem:[#allocation7 + $0x20] ss:$8 sps:$4 sm:$0xff]   ;;  %v403_v36 = vshrl.u32 %v402_v35, 7 }
  0x6f   : > { %693 = vmatprep.subr.bf16.mxu0 %v982_v0  ;;  %v796_v7 = vld [vmem:[#allocation7 + $0x14] ss:$8 sps:$4 sm:$0xff]   ;;  %493 = vmatpush1.bf16.msra.mxu1 %v795_v5  ;;  %v798_v8 = vld [vmem:[#allocation7 + $0x10] ss:$8 sps:$4 sm:$0xff]   ;;  %v789_v10 = vld [vmem:[#allocation5 + $0x20] sm:$0xff]   ;;  %s650_s10 = sshll.u32 %s1177_s14, 4 }
  0x70   : > { %494 = vmatprep.subr.bf16.mxu1 %v796_v7  ;;  %v802_v12 = vld [vmem:[#allocation7 + $0x34] ss:$8 sps:$4 sm:$0xff]   ;;  %v790_v13 = vld [vmem:[#allocation5 + $0x28] sm:$0xff]   ;;  %v804_v14 = vld [vmem:[#allocation7 + $0x30] ss:$8 sps:$4 sm:$0xff]   ;;  %524 = vmatprep.mubr.bf16.mxu1 %v984_v26  ;;  %v404_v37 = vsub.s32 0, %v403_v36 }
  0x71   : > { %v805_v15 = vld [vmem:[#allocation7 + $0x44] ss:$8 sps:$4 sm:$0xff]   ;;  %v791_v16 = vld [vmem:[#allocation5 + $0x30] sm:$0xff]   ;;  %v807_v17 = vld [vmem:[#allocation7 + $0x40] ss:$8 sps:$4 sm:$0xff]   ;;  %v408_v39 = vsub.s32 1, %v403_v36 }
  0x72   : > { %694 = vmatpush3.bf16.msra.mxu0 %v786_v2  ;;  %v808_v18 = vld [vmem:[#allocation7 + $0x54] ss:$8 sps:$4 sm:$0xff]   ;;  %v810_v20 = vld [vmem:[#allocation7 + $0x50] ss:$8 sps:$4 sm:$0xff]   ;;  %v811_v21 = vld [vmem:[#allocation7 + $0x64] ss:$8 sps:$4 sm:$0xff]  }
  0x73   : > { %695 = vmatprep.subr.bf16.mxu0 %v982_v0  ;;  %495 = vmatpush1.bf16.msra.mxu1 %v798_v8  ;;  %v792_v19 = vld [vmem:[#allocation5 + $0x38] sm:$0xff]   ;;  %v813_v23 = vld [vmem:[#allocation7 + $0x60] ss:$8 sps:$4 sm:$0xff]   ;;  %s681_s13 = sshll.u32 %s1037_s22, 8  ;;  %s268_s7 = scalar_lea.vmem [#allocation8], %s650_s10 }
  0x74   : > { %496 = vmatprep.subr.bf16.mxu1 %v799_v9  ;;  %v270_v22 = vld [vmem:[%s1181_s23] sm:$0xf]  ;;  %s550_s6 = sshll.u32 %s268_s7, 4  ;;  %s1203_s9 = scalar_lea.hbm %s1251_s5, %s681_s13  ;;  %s1205_s6 = int_to_ptr.vmem [resolvable:$true] %s550_s6 }
  0x75   : > { %v814_v24 = vld [vmem:[#allocation7 + $0x74] ss:$8 sps:$4 sm:$0xff]   ;;  %v816_v25 = vld [vmem:[#allocation7 + $0x70] ss:$8 sps:$4 sm:$0xff]   ;;  %s536_s22 = scalar_lea.sflag [#allocation4], %s1177_s14  ;;  %s903_s11 = scalar_lea.vmem %s1205_s6, 256 }
  0x76   : > { %696 = vmatpush3.bf16.msra.mxu0 %v787_v3  ;;  %v651_v27 = vld [vmem:[%s1248_s2] ss:$0 sm:$0xff]  ;;  %p904_p1 = scmp.ne.s32.totalorder %s1205_s6, %s903_s11  ;;  %s985_s15 = smov [#allocation8]  }
  0x77   : > { %697 = vmatprep.subr.bf16.mxu0 %v982_v0  ;;  %497 = vmatpush1.bf16.msra.mxu1 %v801_v11  ;;  %v400_v38 = vld [vmem:[%s1250_s4] sm:$0x3]  ;;  %s907_s17 = sshll.u32 %s985_s15, 4  ;;  %s908_s17 = int_to_ptr.vmem [resolvable:$false] %s907_s17 }
  0x78   : > { %498 = vmatprep.subr.bf16.mxu1 %v802_v12  ;;  %v405_v40 = vrot.slane %v400_v38, %v404_v37  ;;  %v409_v41 = vrot.slane %v400_v38, %v408_v39  ;;  %p905_p2 = pnand %p904_p1, %p1131_p6  ;;  %s909_s23 = scalar_lea.vmem %s908_s17, 512 }
  0x79   : > { %p910_p8 = scmp.lt.s32.totalorder %s1205_s6, %s908_s17  ;;  %p911_p13 = scmp.lt.s32.totalorder %s909_s23, %s903_s11 }
  0x7a   : > { %698 = vmatpush3.bf16.msra.mxu0 %v788_v6  ;;  %p906_p4 = pneg %p905_p2 }
  0x7b   : > { %699 = vmatprep.subr.bf16.mxu0 %v982_v0  ;;  %499 = vmatpush1.bf16.msra.mxu1 %v804_v14  ;;  %p912_p3 = por %p911_p13, %p910_p8 }
  0x7c   : > { %500 = vmatprep.subr.bf16.mxu1 %v805_v15 }
  0x7d   : > { %p913_p7 = pnand %p912_p3, %p906_p4 }
  0x7e   : > { %700 = vmatpush3.bf16.msra.mxu0 %v789_v10 }
  0x7f   : > { %701 = vmatprep.subr.bf16.mxu0 %v982_v0  ;;  %501 = vmatpush1.bf16.msra.mxu1 %v807_v17 }
  0x80   : > { %502 = vmatprep.subr.bf16.mxu1 %v808_v18 }
  0x82   : > { %702 = vmatpush3.bf16.msra.mxu0 %v790_v13 }
  0x83   : > { %703 = vmatprep.subr.bf16.mxu0 %v982_v0  ;;  %503 = vmatpush1.bf16.msra.mxu1 %v810_v20 }
  0x84   : > { %504 = vmatprep.subr.bf16.mxu1 %v811_v21 }
  0x86   : > { %704 = vmatpush3.bf16.msra.mxu0 %v791_v16 }
  0x87   : > { %705 = vmatprep.subr.bf16.mxu0 %v982_v0  ;;  %505 = vmatpush1.bf16.msra.mxu1 %v813_v23 }
  0x88   : > { %506 = vmatprep.subr.bf16.mxu1 %v814_v24 }
  0x8a   : > { %706 = vmatpush3.bf16.msra.mxu0 %v792_v19 }
  0x8b   : > { %507 = vmatpush1.bf16.msra.mxu1 %v816_v25 }
  0x8d   : > { %708 = vmatmul.mubr.bf16.vlgmr.msra.gmra.mrb[0].mxu0 %v270_v22 }
 0x160   : > { %v376_v28 = vpop.f32.mrb[0].mxu0 }
 0x161   : > { %v377_v29 = vadd.f32 %v651_v27, %v376_v28  ;;  %v709_v30 = vpop.f32.mrb[1].mxu0 }
 0x162   : > { %v379_v31 = vpop.f32.mrb[2].mxu0 }
 0x163   : > { %v382_v32 = vmax.f32 %v377_v29, 0.0  ;;  %v710_v33 = vpop.f32.mrb[3].mxu0 }
 0x165   : > { %v383_v34 = vpack.c.bf16 %v382_v32, %v382_v32 }
 0x167   : > { %525 = vmatmul.mubr.bf16.vlgmr.msra.gmra.mrb[0].mxu1 %v383_v34 }
 0x23a   : > { %v526_v42 = vpop.f32.mrb[0].mxu1 }
 0x23b   : > { %v527_v43 = vadd.f32 %v526_v42, %v405_v40  ;;  %v528_v44 = vpop.f32.mrb[1].mxu1 }
 0x23c   : > { %v529_v45 = vadd.f32 %v528_v44, %v409_v41  ;;  %v530_v46 = vpop.f32.mrb[2].mxu1 }
 0x23d   : > { %533 = vst [vmem:[%s268_s7] sm:$0xff] %v527_v43  ;;  %v531_v47 = vpop.f32.mrb[3].mxu1 }
 0x23e   : > { %534 = vst [vmem:[%s268_s7 + $0x8] sm:$0xff] %v529_v45 }
 0x23f   : > { %916 = shalt.err (!%p913_p7)
}
 0x240   : > { %s917_s14 = scalar_lea.hbm %s1203_s9, 256  ;;  %s921_s10 = scalar_lea.hbm %s1251_s5, 1280 }
 0x241   : > { %p918_p9 = scmp.ne.s32.totalorder %s1203_s9, %s917_s14  ;;  %p922_p0 = scmp.lt.u32.totalorder %s1203_s9, %s1251_s5 }
 0x242   : > { %p923_p10 = scmp.lt.u32.totalorder %s921_s10, %s917_s14  ;;  %p925_p1 = scmp.lt.u32.totalorder %s917_s14, %s1203_s9 }
 0x243   : > { %p919_p12 = pnand %p918_p9, %p1131_p6 }
 0x244   : > { %p924_p11 = por %p923_p10, %p922_p0 }
 0x245   : > { %p920_p5 = pneg %p919_p12 }
 0x246   : > { %p926_p2 = por %p925_p1, %p924_p11 }
 0x248   : > { %p927_p4 = pnand %p926_p2, %p920_p5 }
 0x24a   : > { %930 = shalt.err (!%p927_p4)
}
 0x24b   : > { %721 = dma.vmem_to_hbm [thread:$0]  (%p1131_p6), %s1205_s6, 256, %s1203_s9, %s536_s22  }
 0x24c PF: > { %p743_p8 = scmp.ge.s32.totalorder %s973_s21, 2  ;;  %s562_s13 = sand.u32 1, %s961_s18  }
 0x24d   : > { %p1266_p13 = scmp.ne.s32.totalorder %s1256_s25, 0  ;;  %s563_s7 = scalar_lea.sflag [#allocation4], %s562_s13 }
 0x24f   : > { %p735_p3 = pnand %p743_p8, %p1266_p13 }
 0x251   : > { %956 = dma.done.wait (!%p735_p3), %s563_s7, 256  }
 0x252   : > { %958 = vsyncadd (!%p735_p3), %s563_s7, 4294967040  ;;  %p19_p7 = scmp.ge.s32.totalorder %s1118_s16, 7   ;;  %s1267_s18 = smov %s965_s19 }
 0x253   : > { %s1268_s19 = smov %s969_s20  ;;  %s1269_s20 = smov %s1127_s27 }
 0x254   : > { %s1270_s21 = smov %s1118_s16  ;;  %21 = sbr.rel (!%p19_p7) target bundleno = 6 (0x6), region = 93 }
 0x25b   :  { %568 = vsyncpa [#allocation3], 1 }
 0x25c   :  { %570 = vsyncpa [#allocation3 + $0x1], 1 }
 0x25d   :  { %571 = vsyncpa [#allocation6], 1 }
 0x25e   :  { %572 = vsyncpa [#allocation4], 1 }
 0x25f   :  { %574 = vsyncpa [#allocation4 + $0x1], 1 }

</bundles_post_ra>
